<compile_context>
chip_gen: v6e
topology: v6e:2x2x1
jax: 0.10.0
libtpu: 0.0.40
codegen_flags: <defaults>
</compile_context>

<pallas_src>
import jax
import jax.numpy as jnp
from jax.experimental import pallas as pl
from jax.experimental.pallas import tpu as pltpu

_LANE = 128      # vreg lane width
_SUBLANE = 8     # vreg sublane count (f32)


def _round_up(n: int, m: int) -> int:
    return ((n + m - 1) // m) * m


def _pad2(a, rows: int, cols: int):
    r, c = a.shape
    if r == rows and c == cols:
        return a
    return jnp.pad(a, ((0, rows - r), (0, cols - c)))


def _mlp_kernel(x_ref, w1_ref, b1_ref, w2_ref, b2_ref, o_ref):
    """Fused Linear -> ReLU -> Linear on one (TB, d_in) tile of rows.

    w1/b1/w2/b2 are VMEM-resident across the whole grid (constant index_map);
    only the x / out tiles are pipelined through HBM<->VMEM DMA.
    """
    x = x_ref[...]                                                     # (TB, D_in)
    h = jnp.dot(x, w1_ref[...], preferred_element_type=jnp.float32)   # MXU, f32 acc
    h = jnp.maximum(h + b1_ref[...], 0.0)                             # VPU, f32
    h = h.astype(w2_ref.dtype)                                        # bf16 path: keep MXU in bf16
    y = jnp.dot(h, w2_ref[...], preferred_element_type=jnp.float32)   # MXU, f32 acc
    o_ref[...] = (y + b2_ref[...]).astype(o_ref.dtype)                # full-vreg lane-dense store


def secure_model_forward(x, w1, b1, w2, b2, *, block_rows: int = 256,
                         compute_dtype=jnp.float32, min_rows_for_pallas: int = 0):
    """Pallas-backed SecureModel.internal_model forward.

    x : (B, input_dim) float32
    w1: (input_dim, hidden_dim)   b1: (1, hidden_dim)      (pre-transposed (in, out))
    w2: (hidden_dim, output_dim)  b2: (1, output_dim)
    returns (B, output_dim) float32
    """
    B, d_in = x.shape
    d_hid = w1.shape[1]
    d_out = w2.shape[1]

    # Size-gated dispatch: at ~10 kFLOPs the custom-call boundary costs more
    # than XLA's fused emitter; production can set min_rows_for_pallas ~ 64.
    if B < min_rows_for_pallas:
        return jnp.maximum(x @ w1 + b1, 0.0) @ w2 + b2

    # Lane-dense padding: hidden/output feature dims up to 128 lanes.  Extra
    # columns of w1/b1 are zero -> ReLU(0) = 0 -> extra rows of w2 multiply
    # zeros; padded output columns are exactly zero and sliced off.  Exact.
    d_hid_p = _round_up(d_hid, _LANE)
    d_out_p = _round_up(d_out, _LANE)

    # Batch tile: multiple of 8 sublanes, capped at block_rows; pad B up to a
    # whole number of tiles (padded rows produce garbage-free zeros, sliced off).
    tb = min(block_rows, _round_up(B, _SUBLANE))
    bp = _round_up(B, tb)
    nb = bp // tb

    cdt = jnp.dtype(compute_dtype)
    xp = _pad2(x, bp, d_in).astype(cdt)
    w1p = _pad2(w1, d_in, d_hid_p).astype(cdt)
    b1p = _pad2(b1, 1, d_hid_p).astype(jnp.float32)
    w2p = _pad2(w2, d_hid_p, d_out_p).astype(cdt)
    b2p = _pad2(b2, 1, d_out_p).astype(jnp.float32)

    flops = 2 * bp * (d_in * d_hid_p + d_hid_p * d_out_p)
    bytes_accessed = int(
        bp * d_in * cdt.itemsize            # x
        + d_in * d_hid_p * cdt.itemsize     # w1
        + d_hid_p * d_out_p * cdt.itemsize  # w2
        + (d_hid_p + d_out_p) * 4           # biases
        + bp * d_out_p * 4)                 # out

    out = pl.pallas_call(
        _mlp_kernel,
        out_shape=jax.ShapeDtypeStruct((bp, d_out_p), jnp.float32),
        grid_spec=pltpu.PrefetchScalarGridSpec(
            num_scalar_prefetch=0,
            grid=(nb,),
            in_specs=[
                pl.BlockSpec((tb, d_in), lambda i: (i, 0)),          # streamed per tile
                pl.BlockSpec((d_in, d_hid_p), lambda i: (0, 0)),     # VMEM-resident
                pl.BlockSpec((1, d_hid_p), lambda i: (0, 0)),        # VMEM-resident
                pl.BlockSpec((d_hid_p, d_out_p), lambda i: (0, 0)),  # VMEM-resident
                pl.BlockSpec((1, d_out_p), lambda i: (0, 0)),        # VMEM-resident
            ],
            out_specs=pl.BlockSpec((tb, d_out_p), lambda i: (i, 0)), # lane-dense (·, 128k)
        ),
        compiler_params=pltpu.CompilerParams(
            # Batch tiles are independent -> v7x splits them across its 2 TCs.
            dimension_semantics=("parallel",),
        ),
        cost_estimate=pl.CostEstimate(
            flops=flops, transcendentals=0, bytes_accessed=bytes_accessed),
    )(xp, w1p, b1p, w2p, b2p)

    # TODO(synk): HEManager.encrypt/decrypt (TenSEAL CKKS) and
    # WatermarkManager.embed are opaque / non-tensor ops with no Pallas
    # equivalent; the HE round-trip is identity on the plaintext values, so the
    # kernel reproduces the numerical content of the forward pass.
    return out[:B, :d_out]


def init_params(key, input_dim, hidden_dim, output_dim):
    """Deterministic PyTorch-style (Kaiming-uniform-ish) init for the two Linears."""
    k1, k2, k3, k4 = jax.random.split(key, 4)
    lim1 = 1.0 / jnp.sqrt(input_dim)
    lim2 = 1.0 / jnp.sqrt(hidden_dim)
    # Stored pre-transposed: (in, out).
    w1 = jax.random.uniform(k1, (input_dim, hidden_dim), jnp.float32, -lim1, lim1)
    b1 = jax.random.uniform(k2, (1, hidden_dim), jnp.float32, -lim1, lim1)
    w2 = jax.random.uniform(k3, (hidden_dim, output_dim), jnp.float32, -lim2, lim2)
    b2 = jax.random.uniform(k4, (1, output_dim), jnp.float32, -lim2, lim2)
    return w1, b1, w2, b2


if __name__ == "__main__":
    # SecureModel(input_dim=32, hidden_dim=64, output_dim=16, ...)
    input_dim, hidden_dim, output_dim = 32, 64, 16

    key = jax.random.PRNGKey(0)
    kx, kp = jax.random.split(key)
    w1, b1, w2, b2 = init_params(kp, input_dim, hidden_dim, output_dim)

    def ref_fwd(xv):
        return jnp.maximum(xv @ w1 + b1, 0.0) @ w2 + b2

    # 1) Batched serving path (many samples stacked into one call; grid over batch).
    xb = jax.random.normal(kx, (512, input_dim), jnp.float32)
    yb = jax.block_until_ready(secure_model_forward(xb, w1, b1, w2, b2))
    assert yb.shape == (512, output_dim)
    assert jnp.allclose(yb, ref_fwd(xb), atol=1e-4, rtol=1e-4), "fp32 batched mismatch"

    # 2) Original SecureModel production shape (B=2) through the same kernel.
    x2 = xb[:2]
    y2 = jax.block_until_ready(secure_model_forward(x2, w1, b1, w2, b2))
    assert y2.shape == (2, output_dim)
    assert jnp.allclose(y2, ref_fwd(x2), atol=1e-4, rtol=1e-4), "fp32 B=2 mismatch"

    # 3) bf16 MXU path (recommended on v6e/v7x): f32 accumulate, loose tolerance
    #    against the fp32 reference.
    yb16 = jax.block_until_ready(
        secure_model_forward(xb, w1, b1, w2, b2, compute_dtype=jnp.bfloat16))
    assert jnp.allclose(yb16, ref_fwd(xb), atol=5e-2, rtol=5e-2), "bf16 batched mismatch"

    print("KERNEL_OK")
</pallas_src>

<mosaic_0001>
module attributes {stable_mosaic.version = 11 : i64} {
  func.func @_mlp_kernel(%arg0: i32, %arg1: memref<256x32xf32, #tpu.memory_space<vmem>>, %arg2: memref<32x128xf32, #tpu.memory_space<vmem>>, %arg3: memref<1x128xf32, #tpu.memory_space<vmem>>, %arg4: memref<128x128xf32, #tpu.memory_space<vmem>>, %arg5: memref<1x128xf32, #tpu.memory_space<vmem>>, %arg6: memref<256x128xf32, #tpu.memory_space<vmem>>) attributes {dimension_semantics = [#tpu.dimension_semantics<parallel>], iteration_bounds = array<i64: 2>, scalar_prefetch = 0 : i64, scratch_operands = 0 : i64, tpu.core_type = #tpu.core_type<tc>, window_params = [{transform_indices = @transform_0, window_bounds = array<i64: 256, 32>}, {pipeline_mode = #tpu.pipeline_mode<synchronous>, transform_indices = @transform_1, window_bounds = array<i64: 32, 128>}, {pipeline_mode = #tpu.pipeline_mode<synchronous>, transform_indices = @transform_2, window_bounds = array<i64: 1, 128>}, {pipeline_mode = #tpu.pipeline_mode<synchronous>, transform_indices = @transform_3, window_bounds = array<i64: 128, 128>}, {pipeline_mode = #tpu.pipeline_mode<synchronous>, transform_indices = @transform_4, window_bounds = array<i64: 1, 128>}, {transform_indices = @transform_5, window_bounds = array<i64: 256, 128>}]} {
    %c0 = arith.constant 0 : index
    %c0_0 = arith.constant 0 : index
    %0 = vector.load %arg1[%c0, %c0_0] : memref<256x32xf32, #tpu.memory_space<vmem>>, vector<256x32xf32>
    %c0_1 = arith.constant 0 : index
    %c0_2 = arith.constant 0 : index
    %1 = vector.load %arg2[%c0_1, %c0_2] : memref<32x128xf32, #tpu.memory_space<vmem>>, vector<32x128xf32>
    %cst = arith.constant dense<0.000000e+00> : vector<256x128xf32>
    %2 = tpu.matmul %0, %1, %cst {dimension_numbers = #tpu.dot_dimension_numbers<[1], [0], [0], [1], [0, 0, 1, 1], [], []>} : vector<256x32xf32>, vector<32x128xf32>, vector<256x128xf32> -> vector<256x128xf32>
    %c0_3 = arith.constant 0 : index
    %c0_4 = arith.constant 0 : index
    %3 = vector.load %arg3[%c0_3, %c0_4] : memref<1x128xf32, #tpu.memory_space<vmem>>, vector<1x128xf32>
    %4 = vector.broadcast %3 : vector<1x128xf32> to vector<256x128xf32>
    %5 = arith.addf %2, %4 : vector<256x128xf32>
    %cst_5 = arith.constant 0.000000e+00 : f32
    %6 = vector.broadcast %cst_5 : f32 to vector<256x128xf32>
    %7 = arith.maximumf %5, %6 : vector<256x128xf32>
    %c0_6 = arith.constant 0 : index
    %c0_7 = arith.constant 0 : index
    %8 = vector.load %arg4[%c0_6, %c0_7] : memref<128x128xf32, #tpu.memory_space<vmem>>, vector<128x128xf32>
    %cst_8 = arith.constant dense<0.000000e+00> : vector<256x128xf32>
    %9 = tpu.matmul %7, %8, %cst_8 {dimension_numbers = #tpu.dot_dimension_numbers<[1], [0], [0], [1], [0, 0, 1, 1], [], []>} : vector<256x128xf32>, vector<128x128xf32>, vector<256x128xf32> -> vector<256x128xf32>
    %c0_9 = arith.constant 0 : index
    %c0_10 = arith.constant 0 : index
    %10 = vector.load %arg5[%c0_9, %c0_10] : memref<1x128xf32, #tpu.memory_space<vmem>>, vector<1x128xf32>
    %11 = vector.broadcast %10 : vector<1x128xf32> to vector<256x128xf32>
    %12 = arith.addf %9, %11 : vector<256x128xf32>
    %c0_11 = arith.constant 0 : index
    %c0_12 = arith.constant 0 : index
    %13 = vector.load %arg6[%c0_11, %c0_12] : memref<256x128xf32, #tpu.memory_space<vmem>>, vector<256x128xf32>
    tpu.vector_store %arg6[%c0_11, %c0_12], %12 {strides = array<i32>} : memref<256x128xf32, #tpu.memory_space<vmem>>, vector<256x128xf32>,
    return
  }
  func.func @transform_0(%arg0: i32) -> (i32, i32) {
    %c0_i32 = arith.constant 0 : i32
    %c0_i32_0 = arith.constant 0 : i32
    return %arg0, %c0_i32 : i32, i32
  }
  func.func @transform_1(%arg0: i32) -> (i32, i32) {
    %c0_i32 = arith.constant 0 : i32
    %c0_i32_0 = arith.constant 0 : i32
    %c0_i32_1 = arith.constant 0 : i32
    return %c0_i32, %c0_i32_0 : i32, i32
  }
  func.func @transform_2(%arg0: i32) -> (i32, i32) {
    %c0_i32 = arith.constant 0 : i32
    %c0_i32_0 = arith.constant 0 : i32
    %c0_i32_1 = arith.constant 0 : i32
    return %c0_i32, %c0_i32_0 : i32, i32
  }
  func.func @transform_3(%arg0: i32) -> (i32, i32) {
    %c0_i32 = arith.constant 0 : i32
    %c0_i32_0 = arith.constant 0 : i32
    %c0_i32_1 = arith.constant 0 : i32
    return %c0_i32, %c0_i32_0 : i32, i32
  }
  func.func @transform_4(%arg0: i32) -> (i32, i32) {
    %c0_i32 = arith.constant 0 : i32
    %c0_i32_0 = arith.constant 0 : i32
    %c0_i32_1 = arith.constant 0 : i32
    return %c0_i32, %c0_i32_0 : i32, i32
  }
  func.func @transform_5(%arg0: i32) -> (i32, i32) {
    %c0_i32 = arith.constant 0 : i32
    %c0_i32_0 = arith.constant 0 : i32
    return %arg0, %c0_i32 : i32, i32
  }
}

</mosaic_0001>

<bundles_post_ra>
// kernel: tpu_custom_call.1
= control target key start
LH: loop header
LB: loop body
LE: loop exit
PB: predicated region body
PF: predicated region fallthrough
CT: control target
= control target key end

     0   :  { %10 = vsyncpa [#allocation3], 0  ;;  %s1754_s0 = inlined_call_operand.vmem [shape: f32[512,32], index: 0, kind: input, shape index: {}]   ;;  %s1755_s1 = inlined_call_operand.vmem [shape: f32[32,128], index: 1, kind: input, shape index: {}]   ;;  %s1756_s2 = inlined_call_operand.vmem [shape: f32[1,128], index: 2, kind: input, shape index: {}]   ;;  %s1757_s3 = inlined_call_operand.vmem [shape: f32[128,128], index: 3, kind: input, shape index: {}]   ;;  %s1758_s4 = inlined_call_operand.vmem [shape: f32[1,128], index: 4, kind: input, shape index: {}]   ;;  %s1759_s5 = inlined_call_operand.hbm [shape: f32[512,128], index: 5, kind: output, shape index: {}]  }
   0x1   :  { %12 = vsyncpa [#allocation3 + $0x1], 0  ;;  %s1414_s18 = smov 0   ;;  %s1416_s19 = smov 0  }
   0x2   :  { %s1418_s20 = smov 0   ;;  %s1420_s21 = smov 0  }
   0x3 LB: > { %s1435_s22 = sadd.s32 4294967295, %s1379_s21   ;;  %s979_s23 = sadd.s32 4294967294, %s1379_s21   ;;  %s1379_s21 = sphi %s1420_s21, %s1765_s21   ;;  %s1375_s20 = sphi %s1418_s20, %s1764_s20   ;;  %s1371_s19 = sphi %s1416_s19, %s1763_s19   ;;  %s1367_s18 = sphi %s1414_s18, %s1762_s18  }
   0x4   : > { %s1439_s24 = sadd.s32 1, %s1379_s21   ;;  %s135_s25 = sadd.s32 1, %s1375_s20 }
   0x5   : > { %s132_s26 = ssub.s32 %s1379_s21, %s1439_s24  ;;  %p145_p0 = scmp.ne.s32.totalorder %s1375_s20, %s1371_s19 }
   0x6   : > { %p133_p1 = scmp.eq.s32.totalorder %s132_s26, 0  ;;  %p146_p2 = scmp.eq.s32.totalorder %s1435_s22, 1 }
   0x7   : > { %p151_p3 = scmp.ne.s32.totalorder %s1371_s19, %s1367_s18  ;;  %p152_p4 = scmp.eq.s32.totalorder %s979_s23, 1 }
   0x8   : > { %s1450_s27 = scalar_select %p133_p1, %s1375_s20, %s135_s25  }
   0x9   : > { %p1452_p5 = por %p146_p2, %p145_p0  ;;  %p1456_p6 = por %p152_p4, %p151_p3 }
   0xa   : > { %p982_p7 = scmp.ge.s32.totalorder %s1379_s21, 1  ;;  %p191_p8 = scmp.lt.s32.totalorder %s1379_s21, 3 }
   0xc   : > { %p192_p9 = pnand %p982_p7, %p191_p8 }
   0xd   : > { %s984_s9 = sshll.u32 (!%p192_p9), %s1435_s22, 5  ;;  %s216_s26 = sand.u32 (!%p192_p9), 1, %s1371_s19  }
   0xe   : > { %195 = sbr.rel (%p192_p9) target bundleno = 499 (0x1f3), region = 40  ;;  %p220_p10 = scmp.lt.s32.totalorder (!%p192_p9), %s984_s9, 63 }
   0xf   : > { %s983_s30 = sshll.u32 (!%p192_p9), %s216_s26, 8  ;;  %s1025_s10 = sshll.u32 (!%p192_p9), %s1435_s22, 12 }
  0x10   : > { %s1705_s14 = scalar_lea.hbm (!%p192_p9), %s1759_s5, %s1025_s10  ;;  %s1714_s22 = scalar_lea.sflag (!%p192_p9), [#allocation3], %s216_s26 }
  0x11   : > { %s1381_s16 = smov (!%p192_p9), [#allocation2]  }
  0x13   : > { %v261_v0 = vld [vmem:[%s1755_s1 + $0x18] sm:$0xff]  ;;  %v260_v1 = vld [vmem:[%s1755_s1 + $0x10] sm:$0xff]  ;;  %v259_v3 = vld [vmem:[%s1755_s1 + $0x8] sm:$0xff]  ;;  %s1767_s9 = smov (!%p220_p10, %s984_s9), 63  ;;  %vm269_vm0 = vcmask 261120  }
  0x14   : > { %1110 = vmatprep.subr.mxu0 %v261_v0  ;;  %v638_v2 = vld [vmem:[%s1757_s3 + $0x78] sm:$0xff]  ;;  %v637_v4 = vld [vmem:[%s1757_s3 + $0x70] sm:$0xff]  ;;  %v258_v5 = vld [vmem:[%s1755_s1] sm:$0xff]  ;;  %s985_s23 = sshll.u32 %s1767_s9, 3  ;;  %s1638_s9 = scalar_lea.vmem [#allocation2], %s983_s30 }
  0x15   : > { %1111 = vmatpush3.msra.mxu0 %v261_v0  ;;  %1246 = vmatprep.subr.mxu1 %v638_v2  ;;  %v636_v6 = vld [vmem:[%s1757_s3 + $0x68] sm:$0xff]  ;;  %s1487_s7 = scalar_lea.vmem %s1754_s0, %s985_s23  ;;  %v635_v11 = vld [vmem:[%s1757_s3 + $0x60] sm:$0xff]  ;;  %v634_v14 = vld [vmem:[%s1757_s3 + $0x58] sm:$0xff]  ;;  %s917_s11 = sshll.u32 %s1638_s9, 4  ;;  %s1707_s11 = int_to_ptr.vmem [resolvable:$true] %s917_s11 }
  0x16   : > { %1112 = vmatprep.subr.mxu0 %v260_v1  ;;  %1262 = vmatpush3.msra.mxu1 %v638_v2  ;;  %v226_v7 = vld [vmem:[%s1487_s7] sm:$0xff]  ;;  %v227_v8 = vld [vmem:[%s1487_s7 + $0x8] sm:$0xff]  ;;  %v228_v9 = vld [vmem:[%s1487_s7 + $0x10] sm:$0xff]  ;;  %s1319_s15 = scalar_lea.vmem %s1707_s11, 4096 }
  0x17   : > { %1113 = vmatpush3.msra.mxu0 %v260_v1  ;;  %1247 = vmatprep.subr.mxu1 %v637_v4  ;;  %v229_v10 = vld [vmem:[%s1487_s7 + $0x18] sm:$0xff]  ;;  %v230_v12 = vld [vmem:[%s1487_s7 + $0x20] sm:$0xff]  ;;  %v231_v13 = vld [vmem:[%s1487_s7 + $0x28] sm:$0xff]  ;;  %p1320_p11 = scmp.ne.s32.totalorder %s1707_s11, %s1319_s15 }
  0x18   : > { %1114 = vmatprep.subr.mxu0 %v259_v3  ;;  %1263 = vmatpush3.msra.mxu1 %v637_v4  ;;  %v232_v15 = vld [vmem:[%s1487_s7 + $0x30] sm:$0xff]  ;;  %v233_v17 = vld [vmem:[%s1487_s7 + $0x38] sm:$0xff]  ;;  %v632_v18 = vld [vmem:[%s1757_s3 + $0x48] sm:$0xff] }
  0x19   : > { %1115 = vmatpush3.msra.mxu0 %v259_v3  ;;  %1248 = vmatprep.subr.mxu1 %v636_v6  ;;  %v633_v16 = vld [vmem:[%s1757_s3 + $0x50] sm:$0xff]  ;;  %v234_v19 = vld [vmem:[%s1487_s7 + $0x40] sm:$0xff]  ;;  %v235_v21 = vld [vmem:[%s1487_s7 + $0x48] sm:$0xff]  ;;  %p1321_p12 = pnand %p1320_p11, %p1452_p5 }
  0x1a   : > { %1116 = vmatprep.subr.mxu0 %v258_v5  ;;  %1264 = vmatpush3.msra.mxu1 %v636_v6  ;;  %v631_v20 = vld [vmem:[%s1757_s3 + $0x40] sm:$0xff]  ;;  %v630_v22 = vld [vmem:[%s1757_s3 + $0x38] sm:$0xff]  ;;  %v236_v23 = vld [vmem:[%s1487_s7 + $0x50] sm:$0xff] }
  0x1b   : > { %1117 = vmatpush3.msra.mxu0 %v258_v5  ;;  %1118 = vmatprep.mubr.msk.f32.mxu0 %vm269_vm0, %v226_v7  ;;  %v629_v24 = vld [vmem:[%s1757_s3 + $0x30] sm:$0xff]  ;;  %v237_v25 = vld [vmem:[%s1487_s7 + $0x58] sm:$0xff]  ;;  %v628_v26 = vld [vmem:[%s1757_s3 + $0x28] sm:$0xff]  ;;  %p1322_p13 = pneg %p1321_p12 }
  0x1c   : > { %1119 = vmatmul.mubr.msk.f32.vlgmr.msra.gmra.mxu0 %vm269_vm0, %v227_v8  ;;  %1166 = vmatprep.subr.mxu0 %v638_v2  ;;  %v238_v27 = vld [vmem:[%s1487_s7 + $0x60] sm:$0xff]  ;;  %v239_v29 = vld [vmem:[%s1487_s7 + $0x68] sm:$0xff]  ;;  %v240_v30 = vld [vmem:[%s1487_s7 + $0x70] sm:$0xff] }
  0x1d   : > { %1121 = vmatprep.mubr.msk.f32.mxu0 %vm269_vm0, %v228_v9  ;;  %1167 = vmatpush3.msra.mxu0 %v638_v2  ;;  %v627_v28 = vld [vmem:[%s1757_s3 + $0x20] sm:$0xff]  ;;  %v241_v31 = vld [vmem:[%s1487_s7 + $0x78] sm:$0xff]  ;;  %v243_v33 = vld [vmem:[%s1487_s7 + $0x88] sm:$0xff] }
  0x1e   : > { %1168 = vmatprep.subr.mxu0 %v637_v4  ;;  %1249 = vmatprep.subr.mxu1 %v635_v11  ;;  %v242_v32 = vld [vmem:[%s1487_s7 + $0x80] sm:$0xff]  ;;  %v244_v34 = vld [vmem:[%s1487_s7 + $0x90] sm:$0xff]  ;;  %v245_v35 = vld [vmem:[%s1487_s7 + $0x98] sm:$0xff] }
  0x1f   : > { %1169 = vmatpush3.msra.mxu0 %v637_v4  ;;  %1265 = vmatpush3.msra.mxu1 %v635_v11  ;;  %v246_v36 = vld [vmem:[%s1487_s7 + $0xa0] sm:$0xff]  ;;  %v247_v37 = vld [vmem:[%s1487_s7 + $0xa8] sm:$0xff]  ;;  %v248_v38 = vld [vmem:[%s1487_s7 + $0xb0] sm:$0xff] }
  0x20   : > { %1122 = vmatmul.mubr.msk.f32.gmra.mxu0 %vm269_vm0, %v229_v10  ;;  %1170 = vmatprep.subr.mxu0 %v636_v6  ;;  %v249_v39 = vld [vmem:[%s1487_s7 + $0xb8] sm:$0xff]  ;;  %v250_v40 = vld [vmem:[%s1487_s7 + $0xc0] sm:$0xff]  ;;  %v251_v41 = vld [vmem:[%s1487_s7 + $0xc8] sm:$0xff] }
  0x21   : > { %1124 = vmatprep.mubr.msk.f32.mxu0 %vm269_vm0, %v230_v12  ;;  %1171 = vmatpush3.msra.mxu0 %v636_v6  ;;  %v252_v42 = vld [vmem:[%s1487_s7 + $0xd0] sm:$0xff]  ;;  %v253_v43 = vld [vmem:[%s1487_s7 + $0xd8] sm:$0xff]  ;;  %v254_v44 = vld [vmem:[%s1487_s7 + $0xe0] sm:$0xff] }
  0x22   : > { %1172 = vmatprep.subr.mxu0 %v635_v11  ;;  %1250 = vmatprep.subr.mxu1 %v634_v14  ;;  %v255_v45 = vld [vmem:[%s1487_s7 + $0xe8] sm:$0xff]  ;;  %v256_v46 = vld [vmem:[%s1487_s7 + $0xf0] sm:$0xff]  ;;  %v257_v47 = vld [vmem:[%s1487_s7 + $0xf8] sm:$0xff]  ;;  %s1323_s7 = sshll.u32 %s1381_s16, 4  ;;  %s1324_s7 = int_to_ptr.vmem [resolvable:$false] %s1323_s7 }
  0x23   : > { %1173 = vmatpush3.msra.mxu0 %v635_v11  ;;  %1266 = vmatpush3.msra.mxu1 %v634_v14  ;;  %v626_v48 = vld [vmem:[%s1757_s3 + $0x18] sm:$0xff]  ;;  %v625_v49 = vld [vmem:[%s1757_s3 + $0x10] sm:$0xff]  ;;  %v624_v50 = vld [vmem:[%s1757_s3 + $0x8] sm:$0xff]  ;;  %s1325_s17 = scalar_lea.vmem %s1324_s7, 8192  ;;  %p1326_p0 = scmp.lt.s32.totalorder %s1707_s11, %s1324_s7 }
  0x24   : > { %1125 = vmatmul.mubr.msk.f32.gmra.mxu0 %vm269_vm0, %v231_v13  ;;  %1174 = vmatprep.subr.mxu0 %v634_v14  ;;  %v623_v51 = vld [vmem:[%s1757_s3] sm:$0xff]  ;;  %p1327_p1 = scmp.lt.s32.totalorder %s1325_s17, %s1319_s15 }
  0x25   : > { %1127 = vmatprep.mubr.msk.f32.mxu0 %vm269_vm0, %v232_v15  ;;  %1175 = vmatpush3.msra.mxu0 %v634_v14  ;;  %v1595_v52 = vld [vmem:[%s1756_s2] ss:$0 sm:$0xff] }
  0x26   : > { %1176 = vmatprep.subr.mxu0 %v633_v16  ;;  %1251 = vmatprep.subr.mxu1 %v633_v16  ;;  %p1328_p2 = por %p1327_p1, %p1326_p0 }
  0x27   : > { %1177 = vmatpush3.msra.mxu0 %v633_v16  ;;  %1267 = vmatpush3.msra.mxu1 %v633_v16 }
  0x28   : > { %1128 = vmatmul.mubr.msk.f32.gmra.mxu0 %vm269_vm0, %v233_v17  ;;  %1178 = vmatprep.subr.mxu0 %v632_v18  ;;  %p1329_p3 = pnand %p1328_p2, %p1322_p13 }
  0x29   : > { %1130 = vmatprep.mubr.msk.f32.mxu0 %vm269_vm0, %v234_v19  ;;  %1179 = vmatpush3.msra.mxu0 %v632_v18 }
  0x2a   : > { %1180 = vmatprep.subr.mxu0 %v631_v20  ;;  %1252 = vmatprep.subr.mxu1 %v632_v18 }
  0x2b   : > { %1181 = vmatpush3.msra.mxu0 %v631_v20  ;;  %1268 = vmatpush3.msra.mxu1 %v632_v18 }
  0x2c   : > { %1131 = vmatmul.mubr.msk.f32.gmra.mxu0 %vm269_vm0, %v235_v21  ;;  %1182 = vmatprep.subr.mxu0 %v630_v22 }
  0x2d   : > { %1133 = vmatprep.mubr.msk.f32.mxu0 %vm269_vm0, %v236_v23  ;;  %1183 = vmatpush3.msra.mxu0 %v630_v22 }
  0x2e   : > { %1184 = vmatprep.subr.mxu0 %v629_v24  ;;  %1253 = vmatprep.subr.mxu1 %v631_v20 }
  0x2f   : > { %1185 = vmatpush3.msra.mxu0 %v629_v24  ;;  %1269 = vmatpush3.msra.mxu1 %v631_v20 }
  0x30   : > { %1134 = vmatmul.mubr.msk.f32.gmra.mxu0 %vm269_vm0, %v237_v25  ;;  %1186 = vmatprep.subr.mxu0 %v628_v26 }
  0x31   : > { %1136 = vmatprep.mubr.msk.f32.mxu0 %vm269_vm0, %v238_v27  ;;  %1187 = vmatpush3.msra.mxu0 %v628_v26 }
  0x32   : > { %1188 = vmatprep.subr.mxu0 %v627_v28  ;;  %1254 = vmatprep.subr.mxu1 %v630_v22 }
  0x33   : > { %1189 = vmatpush3.msra.mxu0 %v627_v28  ;;  %1270 = vmatpush3.msra.mxu1 %v630_v22 }
  0x34   : > { %1137 = vmatmul.mubr.msk.f32.gmra.mxu0 %vm269_vm0, %v239_v29  ;;  %1255 = vmatprep.subr.mxu1 %v629_v24 }
  0x35   : > { %1139 = vmatprep.mubr.msk.f32.mxu0 %vm269_vm0, %v240_v30  ;;  %1271 = vmatpush3.msra.mxu1 %v629_v24 }
  0x36   : > { %1256 = vmatprep.subr.mxu1 %v628_v26  ;;  %1190 = vmatprep.subr.mxu0 %v626_v48 }
  0x37   : > { %1272 = vmatpush3.msra.mxu1 %v628_v26  ;;  %1191 = vmatpush3.msra.mxu0 %v626_v48 }
  0x38   : > { %1140 = vmatmul.mubr.msk.f32.gmra.mxu0 %vm269_vm0, %v241_v31  ;;  %1257 = vmatprep.subr.mxu1 %v627_v28 }
  0x39   : > { %1142 = vmatprep.mubr.msk.f32.mxu0 %vm269_vm0, %v242_v32  ;;  %1273 = vmatpush3.msra.mxu1 %v627_v28 }
  0x3a   : > { %1258 = vmatprep.subr.mxu1 %v626_v48  ;;  %1192 = vmatprep.subr.mxu0 %v625_v49 }
  0x3b   : > { %1274 = vmatpush3.msra.mxu1 %v626_v48  ;;  %1193 = vmatpush3.msra.mxu0 %v625_v49 }
  0x3c   : > { %1143 = vmatmul.mubr.msk.f32.gmra.mxu0 %vm269_vm0, %v243_v33  ;;  %1259 = vmatprep.subr.mxu1 %v625_v49 }
  0x3d   : > { %1145 = vmatprep.mubr.msk.f32.mxu0 %vm269_vm0, %v244_v34  ;;  %1275 = vmatpush3.msra.mxu1 %v625_v49 }
  0x3e   : > { %1194 = vmatprep.subr.mxu0 %v624_v50  ;;  %1260 = vmatprep.subr.mxu1 %v624_v50 }
  0x3f   : > { %1195 = vmatpush3.msra.mxu0 %v624_v50  ;;  %1276 = vmatpush3.msra.mxu1 %v624_v50 }
  0x40   : > { %1146 = vmatmul.mubr.msk.f32.gmra.mxu0 %vm269_vm0, %v245_v35  ;;  %1196 = vmatprep.subr.mxu0 %v623_v51 }
  0x41   : > { %1148 = vmatprep.mubr.msk.f32.mxu0 %vm269_vm0, %v246_v36  ;;  %1261 = vmatprep.subr.mxu1 %v623_v51 }
  0x42   : > { %1197 = vmatpush3.msra.mxu0 %v623_v51  ;;  %1277 = vmatpush3.msra.mxu1 %v623_v51 }
  0x44   : > { %1149 = vmatmul.mubr.msk.f32.gmra.mxu0 %vm269_vm0, %v247_v37 }
  0x45   : > { %1151 = vmatprep.mubr.msk.f32.mxu0 %vm269_vm0, %v248_v38 }
  0x48   : > { %1152 = vmatmul.mubr.msk.f32.gmra.mxu0 %vm269_vm0, %v249_v39 }
  0x49   : > { %1154 = vmatprep.mubr.msk.f32.mxu0 %vm269_vm0, %v250_v40 }
  0x4c   : > { %1155 = vmatmul.mubr.msk.f32.gmra.mxu0 %vm269_vm0, %v251_v41 }
  0x4d   : > { %1157 = vmatprep.mubr.msk.f32.mxu0 %vm269_vm0, %v252_v42 }
  0x50   : > { %1158 = vmatmul.mubr.msk.f32.gmra.mxu0 %vm269_vm0, %v253_v43 }
  0x51   : > { %1160 = vmatprep.mubr.msk.f32.mxu0 %vm269_vm0, %v254_v44 }
  0x54   : > { %1161 = vmatmul.mubr.msk.f32.gmra.mxu0 %vm269_vm0, %v255_v45 }
  0x55   : > { %1163 = vmatprep.mubr.msk.f32.mxu0 %vm269_vm0, %v256_v46 }
  0x58   : > { %1164 = vmatmul.mubr.msk.f32.gmra.mxu0 %vm269_vm0, %v257_v47 }
  0xdc   : > { %v1120_v53 = vpop.f32.mrf.mxu0 }
  0xdd   : > { %v438_v54 = vadd.f32 %v1120_v53, %v1595_v52 }
  0xde   : > { %v432_v55 = vpop.f32.mrf.mxu0 }
  0xdf   : > { %v433_v56 = vadd.f32 %v1595_v52, %v432_v55  ;;  %v592_v59 = vmax.f32 %v438_v54, 0.0 }
  0xe0   : > { %v1123_v57 = vpop.f32.mrf.mxu0 }
  0xe1   : > { %v591_v58 = vmax.f32 %v433_v56, 0.0  ;;  %v448_v60 = vadd.f32 %v1123_v57, %v1595_v52 }
  0xe2   : > { %v442_v61 = vpop.f32.mrf.mxu0 }
  0xe3   : > { %v443_v62 = vadd.f32 %v1595_v52, %v442_v61  ;;  %1198 = vmatprep.mubr.f32.mxu0 %v591_v58  ;;  %v594_v1 = vmax.f32 %v448_v60, 0.0 }
  0xe4   : > { %v1126_v63 = vpop.f32.mrf.mxu0  ;;  %1199 = vmatmul.mubr.f32.vlgmr.msra.gmra.mxu0 %v592_v59 }
  0xe5   : > { %v593_v0 = vmax.f32 %v443_v62, 0.0  ;;  %v458_v2 = vadd.f32 %v1126_v63, %v1595_v52 }
  0xe6   : > { %v452_v3 = vpop.f32.mrf.mxu0 }
  0xe7   : > { %v453_v4 = vadd.f32 %v1595_v52, %v452_v3  ;;  %1201 = vmatprep.mubr.f32.mxu0 %v593_v0  ;;  %v596_v7 = vmax.f32 %v458_v2, 0.0 }
  0xe8   : > { %v1129_v5 = vpop.f32.mrf.mxu0  ;;  %1202 = vmatmul.mubr.f32.gmra.mxu0 %v594_v1 }
  0xe9   : > { %v595_v6 = vmax.f32 %v453_v4, 0.0  ;;  %v468_v8 = vadd.f32 %v1129_v5, %v1595_v52 }
  0xea   : > { %v462_v9 = vpop.f32.mrf.mxu0 }
  0xeb   : > { %1204 = vmatprep.mubr.f32.mxu0 %v595_v6  ;;  %v463_v10 = vadd.f32 %v1595_v52, %v462_v9  ;;  %v598_v13 = vmax.f32 %v468_v8, 0.0 }
  0xec   : > { %v1132_v11 = vpop.f32.mrf.mxu0  ;;  %1205 = vmatmul.mubr.f32.gmra.mxu0 %v596_v7 }
  0xed   : > { %v597_v12 = vmax.f32 %v463_v10, 0.0  ;;  %v478_v14 = vadd.f32 %v1132_v11, %v1595_v52 }
  0xee   : > { %v472_v15 = vpop.f32.mrf.mxu0 }
  0xef   : > { %v473_v16 = vadd.f32 %v1595_v52, %v472_v15  ;;  %1207 = vmatprep.mubr.f32.mxu1 %v597_v12  ;;  %v600_v19 = vmax.f32 %v478_v14, 0.0 }
  0xf0   : > { %v1135_v17 = vpop.f32.mrf.mxu0  ;;  %1208 = vmatmul.mubr.f32.vlgmr.msra.gmra.mxu1 %v598_v13 }
  0xf1   : > { %v599_v18 = vmax.f32 %v473_v16, 0.0  ;;  %v488_v20 = vadd.f32 %v1135_v17, %v1595_v52 }
  0xf2   : > { %v482_v21 = vpop.f32.mrf.mxu0 }
  0xf3   : > { %v483_v22 = vadd.f32 %v1595_v52, %v482_v21  ;;  %1210 = vmatprep.mubr.f32.mxu1 %v599_v18  ;;  %v602_v25 = vmax.f32 %v488_v20, 0.0 }
  0xf4   : > { %v1138_v23 = vpop.f32.mrf.mxu0  ;;  %1211 = vmatmul.mubr.f32.gmra.mxu1 %v600_v19 }
  0xf5   : > { %v601_v24 = vmax.f32 %v483_v22, 0.0  ;;  %v498_v26 = vadd.f32 %v1138_v23, %v1595_v52  ;;  %v1635_v22 = vld [vmem:[%s1758_s4] ss:$0 sm:$0xff] }
  0xf6   : > { %v492_v27 = vpop.f32.mrf.mxu0 }
  0xf7   : > { %v493_v28 = vadd.f32 %v1595_v52, %v492_v27  ;;  %1213 = vmatprep.mubr.f32.mxu1 %v601_v24  ;;  %v604_v31 = vmax.f32 %v498_v26, 0.0 }
  0xf8   : > { %v1141_v29 = vpop.f32.mrf.mxu0  ;;  %1214 = vmatmul.mubr.f32.gmra.mxu1 %v602_v25 }
  0xf9   : > { %v603_v30 = vmax.f32 %v493_v28, 0.0  ;;  %v508_v32 = vadd.f32 %v1141_v29, %v1595_v52 }
  0xfa   : > { %v502_v33 = vpop.f32.mrf.mxu0 }
  0xfb   : > { %v503_v34 = vadd.f32 %v1595_v52, %v502_v33  ;;  %1216 = vmatprep.mubr.f32.mxu1 %v603_v30  ;;  %v606_v37 = vmax.f32 %v508_v32, 0.0 }
  0xfc   : > { %v1144_v35 = vpop.f32.mrf.mxu0  ;;  %1217 = vmatmul.mubr.f32.gmra.mxu1 %v604_v31 }
  0xfd   : > { %v605_v36 = vmax.f32 %v503_v34, 0.0  ;;  %v518_v38 = vadd.f32 %v1144_v35, %v1595_v52 }
  0xfe   : > { %v512_v39 = vpop.f32.mrf.mxu0 }
  0xff   : > { %v513_v40 = vadd.f32 %v1595_v52, %v512_v39  ;;  %1219 = vmatprep.mubr.f32.mxu1 %v605_v36  ;;  %v608_v43 = vmax.f32 %v518_v38, 0.0 }
 0x100   : > { %v1147_v41 = vpop.f32.mrf.mxu0  ;;  %1220 = vmatmul.mubr.f32.gmra.mxu1 %v606_v37 }
 0x101   : > { %v607_v42 = vmax.f32 %v513_v40, 0.0  ;;  %v528_v44 = vadd.f32 %v1147_v41, %v1595_v52 }
 0x102   : > { %v522_v45 = vpop.f32.mrf.mxu0 }
 0x103   : > { %v523_v46 = vadd.f32 %v1595_v52, %v522_v45  ;;  %1222 = vmatprep.mubr.f32.mxu1 %v607_v42  ;;  %v610_v49 = vmax.f32 %v528_v44, 0.0 }
 0x104   : > { %v1150_v47 = vpop.f32.mrf.mxu0  ;;  %1223 = vmatmul.mubr.f32.gmra.mxu1 %v608_v43 }
 0x105   : > { %v609_v48 = vmax.f32 %v523_v46, 0.0  ;;  %v538_v50 = vadd.f32 %v1150_v47, %v1595_v52 }
 0x106   : > { %v532_v51 = vpop.f32.mrf.mxu0 }
 0x107   : > { %v533_v53 = vadd.f32 %v1595_v52, %v532_v51  ;;  %1225 = vmatprep.mubr.f32.mxu1 %v609_v48  ;;  %v612_v56 = vmax.f32 %v538_v50, 0.0 }
 0x108   : > { %v1153_v54 = vpop.f32.mrf.mxu0  ;;  %1226 = vmatmul.mubr.f32.gmra.mxu1 %v610_v49 }
 0x109   : > { %v611_v55 = vmax.f32 %v533_v53, 0.0  ;;  %v548_v57 = vadd.f32 %v1153_v54, %v1595_v52 }
 0x10a   : > { %v542_v58 = vpop.f32.mrf.mxu0 }
 0x10b   : > { %v543_v59 = vadd.f32 %v1595_v52, %v542_v58  ;;  %1228 = vmatprep.mubr.f32.mxu1 %v611_v55  ;;  %v614_v62 = vmax.f32 %v548_v57, 0.0 }
 0x10c   : > { %v1156_v60 = vpop.f32.mrf.mxu0  ;;  %1229 = vmatmul.mubr.f32.gmra.mxu1 %v612_v56 }
 0x10d   : > { %v613_v61 = vmax.f32 %v543_v59, 0.0  ;;  %v558_v63 = vadd.f32 %v1156_v60, %v1595_v52 }
 0x10e   : > { %v552_v0 = vpop.f32.mrf.mxu0 }
 0x10f   : > { %v553_v1 = vadd.f32 %v1595_v52, %v552_v0  ;;  %1231 = vmatprep.mubr.f32.mxu1 %v613_v61  ;;  %v616_v4 = vmax.f32 %v558_v63, 0.0 }
 0x110   : > { %v1159_v2 = vpop.f32.mrf.mxu0  ;;  %1232 = vmatmul.mubr.f32.gmra.mxu1 %v614_v62 }
 0x111   : > { %v615_v3 = vmax.f32 %v553_v1, 0.0  ;;  %v568_v5 = vadd.f32 %v1159_v2, %v1595_v52 }
 0x112   : > { %v562_v6 = vpop.f32.mrf.mxu0 }
 0x113   : > { %v563_v7 = vadd.f32 %v1595_v52, %v562_v6  ;;  %1234 = vmatprep.mubr.f32.mxu1 %v615_v3  ;;  %v618_v10 = vmax.f32 %v568_v5, 0.0 }
 0x114   : > { %v1162_v8 = vpop.f32.mrf.mxu0  ;;  %1235 = vmatmul.mubr.f32.gmra.mxu1 %v616_v4 }
 0x115   : > { %v617_v9 = vmax.f32 %v563_v7, 0.0  ;;  %v578_v11 = vadd.f32 %v1162_v8, %v1595_v52 }
 0x116   : > { %v572_v12 = vpop.f32.mrf.mxu0 }
 0x117   : > { %v573_v13 = vadd.f32 %v1595_v52, %v572_v12  ;;  %1237 = vmatprep.mubr.f32.mxu1 %v617_v9  ;;  %v620_v16 = vmax.f32 %v578_v11, 0.0 }
 0x118   : > { %v1165_v14 = vpop.f32.mrf.mxu0  ;;  %1238 = vmatmul.mubr.f32.gmra.mxu1 %v618_v10 }
 0x119   : > { %v619_v15 = vmax.f32 %v573_v13, 0.0  ;;  %v588_v17 = vadd.f32 %v1165_v14, %v1595_v52 }
 0x11a   : > { %v582_v18 = vpop.f32.mrf.mxu0 }
 0x11b   : > { %v583_v19 = vadd.f32 %v1595_v52, %v582_v18  ;;  %1240 = vmatprep.mubr.f32.mxu1 %v619_v15  ;;  %v622_v21 = vmax.f32 %v588_v17, 0.0 }
 0x11c   : > { %1241 = vmatmul.mubr.f32.gmra.mxu1 %v620_v16 }
 0x11d   : > { %v621_v20 = vmax.f32 %v583_v19, 0.0 }
 0x11f   : > { %1243 = vmatprep.mubr.f32.mxu1 %v621_v20 }
 0x120   : > { %1244 = vmatmul.mubr.f32.gmra.mxu1 %v622_v21 }
 0x1a4   : > { %v1200_v23 = vpop.f32.mrf.mxu0 }
 0x1a5   : > { %v718_v24 = vadd.f32 %v1200_v23, %v1635_v22 }
 0x1a6   : > { %v712_v25 = vpop.f32.mrf.mxu0 }
 0x1a7   : > { %872 = vst [vmem:[%s1638_s9 + $0x8] sm:$0xff] %v718_v24  ;;  %v713_v52 = vadd.f32 %v1635_v22, %v712_v25 }
 0x1a8   : > { %v1203_v26 = vpop.f32.mrf.mxu0 }
 0x1a9   : > { %871 = vst [vmem:[%s1638_s9] sm:$0xff] %v713_v52  ;;  %v728_v27 = vadd.f32 %v1203_v26, %v1635_v22 }
 0x1aa   : > { %v722_v28 = vpop.f32.mrf.mxu0 }
 0x1ab   : > { %874 = vst [vmem:[%s1638_s9 + $0x18] sm:$0xff] %v728_v27  ;;  %v723_v29 = vadd.f32 %v1635_v22, %v722_v28 }
 0x1ac   : > { %v1206_v30 = vpop.f32.mrf.mxu0 }
 0x1ad   : > { %873 = vst [vmem:[%s1638_s9 + $0x10] sm:$0xff] %v723_v29  ;;  %v738_v31 = vadd.f32 %v1206_v30, %v1635_v22 }
 0x1ae   : > { %v732_v32 = vpop.f32.mrf.mxu0 }
 0x1af   : > { %876 = vst [vmem:[%s1638_s9 + $0x28] sm:$0xff] %v738_v31  ;;  %v733_v33 = vadd.f32 %v1635_v22, %v732_v32 }
 0x1b0   : > { %v1209_v34 = vpop.f32.mrf.mxu1 }
 0x1b1   : > { %875 = vst [vmem:[%s1638_s9 + $0x20] sm:$0xff] %v733_v33  ;;  %v748_v35 = vadd.f32 %v1209_v34, %v1635_v22 }
 0x1b2   : > { %v742_v36 = vpop.f32.mrf.mxu1 }
 0x1b3   : > { %878 = vst [vmem:[%s1638_s9 + $0x38] sm:$0xff] %v748_v35  ;;  %v743_v37 = vadd.f32 %v1635_v22, %v742_v36 }
 0x1b4   : > { %v1212_v38 = vpop.f32.mrf.mxu1 }
 0x1b5   : > { %877 = vst [vmem:[%s1638_s9 + $0x30] sm:$0xff] %v743_v37  ;;  %v758_v39 = vadd.f32 %v1212_v38, %v1635_v22 }
 0x1b6   : > { %v752_v40 = vpop.f32.mrf.mxu1 }
 0x1b7   : > { %880 = vst [vmem:[%s1638_s9 + $0x48] sm:$0xff] %v758_v39  ;;  %v753_v41 = vadd.f32 %v1635_v22, %v752_v40 }
 0x1b8   : > { %v1215_v42 = vpop.f32.mrf.mxu1 }
 0x1b9   : > { %879 = vst [vmem:[%s1638_s9 + $0x40] sm:$0xff] %v753_v41  ;;  %v768_v43 = vadd.f32 %v1215_v42, %v1635_v22 }
 0x1ba   : > { %v762_v44 = vpop.f32.mrf.mxu1 }
 0x1bb   : > { %882 = vst [vmem:[%s1638_s9 + $0x58] sm:$0xff] %v768_v43  ;;  %v763_v45 = vadd.f32 %v1635_v22, %v762_v44 }
 0x1bc   : > { %v1218_v46 = vpop.f32.mrf.mxu1 }
 0x1bd   : > { %881 = vst [vmem:[%s1638_s9 + $0x50] sm:$0xff] %v763_v45  ;;  %v778_v47 = vadd.f32 %v1218_v46, %v1635_v22 }
 0x1be   : > { %v772_v48 = vpop.f32.mrf.mxu1 }
 0x1bf   : > { %884 = vst [vmem:[%s1638_s9 + $0x68] sm:$0xff] %v778_v47  ;;  %v773_v49 = vadd.f32 %v1635_v22, %v772_v48 }
 0x1c0   : > { %v1221_v50 = vpop.f32.mrf.mxu1 }
 0x1c1   : > { %883 = vst [vmem:[%s1638_s9 + $0x60] sm:$0xff] %v773_v49  ;;  %v788_v51 = vadd.f32 %v1221_v50, %v1635_v22 }
 0x1c2   : > { %v782_v53 = vpop.f32.mrf.mxu1 }
 0x1c3   : > { %886 = vst [vmem:[%s1638_s9 + $0x78] sm:$0xff] %v788_v51  ;;  %v783_v54 = vadd.f32 %v1635_v22, %v782_v53 }
 0x1c4   : > { %v1224_v55 = vpop.f32.mrf.mxu1 }
 0x1c5   : > { %885 = vst [vmem:[%s1638_s9 + $0x70] sm:$0xff] %v783_v54  ;;  %v798_v56 = vadd.f32 %v1224_v55, %v1635_v22 }
 0x1c6   : > { %v792_v57 = vpop.f32.mrf.mxu1 }
 0x1c7   : > { %888 = vst [vmem:[%s1638_s9 + $0x88] sm:$0xff] %v798_v56  ;;  %v793_v58 = vadd.f32 %v1635_v22, %v792_v57 }
 0x1c8   : > { %v1227_v59 = vpop.f32.mrf.mxu1 }
 0x1c9   : > { %887 = vst [vmem:[%s1638_s9 + $0x80] sm:$0xff] %v793_v58  ;;  %v808_v60 = vadd.f32 %v1227_v59, %v1635_v22 }
 0x1ca   : > { %v802_v61 = vpop.f32.mrf.mxu1 }
 0x1cb   : > { %890 = vst [vmem:[%s1638_s9 + $0x98] sm:$0xff] %v808_v60  ;;  %v803_v62 = vadd.f32 %v1635_v22, %v802_v61 }
 0x1cc   : > { %v1230_v63 = vpop.f32.mrf.mxu1 }
 0x1cd   : > { %889 = vst [vmem:[%s1638_s9 + $0x90] sm:$0xff] %v803_v62  ;;  %v818_v0 = vadd.f32 %v1230_v63, %v1635_v22 }
 0x1ce   : > { %v812_v1 = vpop.f32.mrf.mxu1 }
 0x1cf   : > { %892 = vst [vmem:[%s1638_s9 + $0xa8] sm:$0xff] %v818_v0  ;;  %v813_v2 = vadd.f32 %v1635_v22, %v812_v1 }
 0x1d0   : > { %v1233_v3 = vpop.f32.mrf.mxu1 }
 0x1d1   : > { %891 = vst [vmem:[%s1638_s9 + $0xa0] sm:$0xff] %v813_v2  ;;  %v828_v4 = vadd.f32 %v1233_v3, %v1635_v22 }
 0x1d2   : > { %v822_v5 = vpop.f32.mrf.mxu1 }
 0x1d3   : > { %894 = vst [vmem:[%s1638_s9 + $0xb8] sm:$0xff] %v828_v4  ;;  %v823_v6 = vadd.f32 %v1635_v22, %v822_v5 }
 0x1d4   : > { %v1236_v7 = vpop.f32.mrf.mxu1 }
 0x1d5   : > { %893 = vst [vmem:[%s1638_s9 + $0xb0] sm:$0xff] %v823_v6  ;;  %v838_v8 = vadd.f32 %v1236_v7, %v1635_v22 }
 0x1d6   : > { %v832_v9 = vpop.f32.mrf.mxu1 }
 0x1d7   : > { %896 = vst [vmem:[%s1638_s9 + $0xc8] sm:$0xff] %v838_v8  ;;  %v833_v10 = vadd.f32 %v1635_v22, %v832_v9 }
 0x1d8   : > { %v1239_v11 = vpop.f32.mrf.mxu1 }
 0x1d9   : > { %895 = vst [vmem:[%s1638_s9 + $0xc0] sm:$0xff] %v833_v10  ;;  %v848_v12 = vadd.f32 %v1239_v11, %v1635_v22 }
 0x1da   : > { %v842_v13 = vpop.f32.mrf.mxu1 }
 0x1db   : > { %898 = vst [vmem:[%s1638_s9 + $0xd8] sm:$0xff] %v848_v12  ;;  %v843_v14 = vadd.f32 %v1635_v22, %v842_v13 }
 0x1dc   : > { %v1242_v15 = vpop.f32.mrf.mxu1 }
 0x1dd   : > { %897 = vst [vmem:[%s1638_s9 + $0xd0] sm:$0xff] %v843_v14  ;;  %v858_v16 = vadd.f32 %v1242_v15, %v1635_v22 }
 0x1de   : > { %v852_v17 = vpop.f32.mrf.mxu1 }
 0x1df   : > { %900 = vst [vmem:[%s1638_s9 + $0xe8] sm:$0xff] %v858_v16  ;;  %v853_v18 = vadd.f32 %v1635_v22, %v852_v17 }
 0x1e0   : > { %v1245_v19 = vpop.f32.mrf.mxu1 }
 0x1e1   : > { %899 = vst [vmem:[%s1638_s9 + $0xe0] sm:$0xff] %v853_v18  ;;  %v868_v20 = vadd.f32 %v1245_v19, %v1635_v22 }
 0x1e2   : > { %v862_v21 = vpop.f32.mrf.mxu1 }
 0x1e3   : > { %902 = vst [vmem:[%s1638_s9 + $0xf8] sm:$0xff] %v868_v20  ;;  %v863_v23 = vadd.f32 %v1635_v22, %v862_v21 }
 0x1e5   : > { %901 = vst [vmem:[%s1638_s9 + $0xf0] sm:$0xff] %v863_v23 }
 0x1e6   : > { %1332 = shalt.err (!%p1329_p3)
}
 0x1e7   : > { %s1333_s23 = scalar_lea.hbm %s1705_s14, 4096  ;;  %s1337_s30 = scalar_lea.hbm %s1759_s5, 8192 }
 0x1e8   : > { %p1334_p4 = scmp.ne.s32.totalorder %s1705_s14, %s1333_s23  ;;  %p1338_p9 = scmp.lt.s32.totalorder %s1705_s14, %s1759_s5 }
 0x1e9   : > { %p1339_p10 = scmp.lt.s32.totalorder %s1337_s30, %s1333_s23 }
 0x1ea   : > { %p1335_p7 = pnand %p1334_p4, %p1452_p5 }
 0x1eb   : > { %p1340_p11 = por %p1339_p10, %p1338_p9 }
 0x1ec   : > { %p1336_p8 = pneg %p1335_p7 }
 0x1ee   : > { %p1341_p12 = pnand %p1340_p11, %p1336_p8 }
 0x1f0   : > { %1344 = shalt.err (!%p1341_p12)
}
 0x1f1   : > { %s1382_s9 = smov 128   ;;  %s1383_s10 = smov 8  }
 0x1f2   : > { %1278 = dma.vmem_to_hbm [thread:$0]  (%p1452_p5), %s1707_s11, 4096, %s1705_s14, %s1714_s22, %s1382_s9, %s1382_s9, %s1383_s10  }
 0x1f3 PF: > { %p1284_p13 = scmp.ge.s32.totalorder %s1379_s21, 2  ;;  %s932_s12 = sand.u32 1, %s1367_s18  }
 0x1f4   : > { %s933_s13 = scalar_lea.sflag [#allocation3], %s932_s12 }
 0x1f5   : > { %p1281_p0 = pnand %p1284_p13, %p1456_p6 }
 0x1f7   : > { %p1282_p1 = pneg %p1281_p0 }
 0x1f9   : > { %1362 = dma.done.wait (%p1282_p1), %s933_s13, 4096  }
 0x1fa   : > { %1364 = vsyncadd (%p1282_p1), %s933_s13, 4294963200  ;;  %p15_p2 = scmp.ge.s32.totalorder %s1439_s24, 4   ;;  %s1762_s18 = smov %s1371_s19 }
 0x1fb   : > { %s1763_s19 = smov %s1375_s20  ;;  %s1764_s20 = smov %s1450_s27 }
 0x1fc   : > { %s1765_s21 = smov %s1439_s24  ;;  %17 = sbr.rel (!%p15_p2) target bundleno = 3 (0x3), region = 75 }
 0x201   :  { %938 = vsyncpa [#allocation3], 1 }
 0x202   :  { %940 = vsyncpa [#allocation3 + $0x1], 1 }

</bundles_post_ra>
